<compile_context>
chip_gen: v7x
topology: tpu7x:2x2x1
jax: 0.10.0
libtpu: 0.0.40
codegen_flags: <defaults>
</compile_context>

<pallas_src>
import functools

import jax
import jax.numpy as jnp
from jax import lax
from jax.experimental import pallas as pl
from jax.experimental.pallas import tpu as pltpu


def _round_up(x, m):
    return (x + m - 1) // m * m


def _pad2(a, rows, cols, dtype):
    """Zero-pad a (possibly 1-D) array to (rows, cols) and cast."""
    a = jnp.asarray(a)
    if a.ndim == 1:
        a = a[None, :]
    out = jnp.zeros((rows, cols), dtype=dtype)
    return out.at[: a.shape[0], : a.shape[1]].set(a.astype(dtype))


def _tpu_budget():
    """Per-generation VMEM budget / tile cap (conservative v7x fallback)."""
    vmem_bytes = 64 * 1024 * 1024
    try:
        info = pltpu.get_tpu_info()
        vmem_bytes = int(info.vmem_capacity_bytes)
    except Exception:
        pass
    if vmem_bytes >= 100 * 1024 * 1024:
        # v5e / v6e: 128 MiB VMEM -> bigger tiles, higher scoped limit.
        return {"vmem_limit": 96 * 1024 * 1024, "max_tile": 1024,
                "prefer_even_row_tiles": False}
    # v7x: 64 MiB per TensorCore -> 512 tiles with headroom; prefer an even
    # row-tile count so the parallel axis splits across both TensorCores.
    return {"vmem_limit": 48 * 1024 * 1024, "max_tile": 512,
            "prefer_even_row_tiles": True}


def _pick_tile(n_p, max_tile, prefer_even_count=False):
    """Largest multiple-of-128 tile <= max_tile that divides n_p."""
    m = n_p // 128
    divisors = [128 * k for k in range(1, m + 1)
                if m % k == 0 and 128 * k <= max_tile]
    if prefer_even_count:
        even = [t for t in divisors if (n_p // t) % 2 == 0]
        if even:
            return max(even)
    return max(divisors)


# ---------------------------------------------------------------------------
# Kernel 1: feature transform  S = X @ W    (bf16 in, f32 MXU accumulation)
# Used only for layer 1 when f_in_padded > nhid_padded (otherwise fused).
# ---------------------------------------------------------------------------
def feature_matmul_kernel(x_ref, w_ref, out_ref):
    out_ref[...] = jnp.dot(
        x_ref[...], w_ref[...], preferred_element_type=jnp.float32
    ).astype(out_ref.dtype)


def feature_matmul(x, w, *, tm, vmem_limit, out_dtype=jnp.bfloat16):
    n_p, k_p = x.shape
    _, f_out = w.shape
    cost = pl.CostEstimate(
        flops=2 * n_p * k_p * f_out,
        transcendentals=0,
        bytes_accessed=int(
            x.size * x.dtype.itemsize
            + w.size * w.dtype.itemsize
            + n_p * f_out * jnp.dtype(out_dtype).itemsize
        ),
    )
    return pl.pallas_call(
        feature_matmul_kernel,
        out_shape=jax.ShapeDtypeStruct((n_p, f_out), out_dtype),
        grid_spec=pltpu.PrefetchScalarGridSpec(
            num_scalar_prefetch=0,
            grid=(n_p // tm,),
            in_specs=[
                pl.BlockSpec((tm, k_p), lambda i: (i, 0)),
                pl.BlockSpec((k_p, f_out), lambda i: (0, 0)),
            ],
            out_specs=pl.BlockSpec((tm, f_out), lambda i: (i, 0)),
        ),
        compiler_params=pltpu.CompilerParams(
            dimension_semantics=("parallel",),
            vmem_limit_bytes=vmem_limit,
        ),
        cost_estimate=cost,
    )(x, w)


# ---------------------------------------------------------------------------
# Kernel 2: graph aggregation  H = act(adj @ S + b)      (optionally fused:
#           H = act(adj @ (S @ W) + b), with W resident in VMEM)
# Grid: (row tiles i [parallel], contraction tiles k [arbitrary]).
# f32 accumulator in VMEM scratch; bias + activation only in the finalize step.
# S is held fully resident in VMEM when it fits (constant index map + pl.ds
# slice per k step); adj is the only HBM-streamed operand (triple-buffered).
# ---------------------------------------------------------------------------
def aggregate_kernel(adj_ref, s_ref, b_ref, *rest, activation, valid_cols, tk,
                     support_resident, fuse_weight):
    if fuse_weight:
        w_ref, out_ref, acc_ref = rest
    else:
        out_ref, acc_ref = rest

    k = pl.program_id(1)

    @pl.when(k == 0)
    def _():
        acc_ref[...] = jnp.zeros_like(acc_ref)

    if support_resident:
        row0 = pl.multiple_of(k * tk, tk)
        s_blk = s_ref[pl.ds(row0, tk), :]
    else:
        s_blk = s_ref[...]

    if fuse_weight:
        # On-the-fly projection of the support k-tile with the resident weight.
        # The recompute is free: the kernel is HBM-bound on adj, not MXU-bound.
        s_blk = jnp.dot(
            s_blk, w_ref[...], preferred_element_type=jnp.float32
        ).astype(adj_ref.dtype)

    acc_ref[...] += jnp.dot(
        adj_ref[...], s_blk, preferred_element_type=jnp.float32
    )

    @pl.when(k == pl.num_programs(1) - 1)
    def _():
        h = acc_ref[...] + b_ref[...]  # bias added once, on the full sum
        if activation == "relu":
            h = jnp.maximum(h, 0.0)
        elif activation == "log_softmax":
            # mask padded class columns to -inf so they don't affect the norm
            col = lax.broadcasted_iota(jnp.int32, h.shape, 1)
            h = jnp.where(col < valid_cols, h, -jnp.inf)
            m = jnp.max(h, axis=1, keepdims=True)
            z = h - m
            lse = jnp.log(jnp.sum(jnp.exp(z), axis=1, keepdims=True))
            h = z - lse
        out_ref[...] = h.astype(out_ref.dtype)


def graph_aggregate(adj, s, b, *, tm, tk, activation, valid_cols, out_dtype,
                    vmem_limit, w=None):
    n_p = adj.shape[0]
    f_s = s.shape[1]                              # support feature width
    f_out = w.shape[1] if w is not None else f_s  # output feature width
    fuse_weight = w is not None

    # Keep S fully resident in VMEM when it (double-buffered) uses at most half
    # the scoped budget; otherwise fall back to streaming (tk, f_s) blocks.
    support_resident = (2 * n_p * f_s * s.dtype.itemsize) <= (vmem_limit // 2)

    kern = functools.partial(
        aggregate_kernel, activation=activation, valid_cols=valid_cols, tk=tk,
        support_resident=support_resident, fuse_weight=fuse_weight,
    )

    s_reads = 1 if support_resident else n_p // tm
    flops = 2 * n_p * n_p * f_out
    if fuse_weight:
        flops += 2 * n_p * (n_p // tm) * f_s * f_out  # on-the-fly projection
    cost = pl.CostEstimate(
        flops=flops,
        transcendentals=n_p * f_out if activation == "log_softmax" else 0,
        bytes_accessed=int(
            adj.size * adj.dtype.itemsize
            + s_reads * s.size * s.dtype.itemsize
            + b.size * b.dtype.itemsize
            + (w.size * w.dtype.itemsize if fuse_weight else 0)
            + n_p * f_out * jnp.dtype(out_dtype).itemsize
        ),
    )

    # adj is the only streamed HBM operand on the critical path: triple-buffer.
    adj_spec = pl.BlockSpec((tm, tk), lambda i, k: (i, k),
                            pipeline_mode=pl.Buffered(3))
    if support_resident:
        s_spec = pl.BlockSpec((n_p, f_s), lambda i, k: (0, 0))   # resident
    else:
        s_spec = pl.BlockSpec((tk, f_s), lambda i, k: (k, 0))    # streamed
    in_specs = [adj_spec, s_spec,
                pl.BlockSpec((1, f_out), lambda i, k: (0, 0))]   # bias (full)
    operands = [adj, s, b]
    if fuse_weight:
        in_specs.append(pl.BlockSpec((f_s, f_out), lambda i, k: (0, 0)))
        operands.append(w)

    return pl.pallas_call(
        kern,
        out_shape=jax.ShapeDtypeStruct((n_p, f_out), out_dtype),
        grid_spec=pltpu.PrefetchScalarGridSpec(
            num_scalar_prefetch=0,
            grid=(n_p // tm, n_p // tk),
            in_specs=in_specs,
            out_specs=pl.BlockSpec((tm, f_out), lambda i, k: (i, 0)),
            scratch_shapes=[pltpu.VMEM((tm, f_out), jnp.float32)],
        ),
        compiler_params=pltpu.CompilerParams(
            dimension_semantics=("parallel", "arbitrary"),
            vmem_limit_bytes=vmem_limit,
        ),
        cost_estimate=cost,
    )(*operands)


# ---------------------------------------------------------------------------
# Full GCNMod forward
# ---------------------------------------------------------------------------
def gcn_mod_forward(x, adj, w1, b1, w2, b2):
    N, nfeat = x.shape
    nhid = w1.shape[1]
    nclass = w2.shape[1]

    budget = _tpu_budget()
    vmem_limit = budget["vmem_limit"]

    # Pad N only to the 128-lane granule; pick a tile that divides n_p.
    n_p = _round_up(N, 128)
    tile = _pick_tile(n_p, budget["max_tile"],
                      prefer_even_count=budget["prefer_even_row_tiles"])

    # Lane-dense feature dims (exactly 128-multiples; MXU has slack, HBM not).
    f_in = _round_up(nfeat, 128)
    h_p = _round_up(nhid, 128)
    c_p = _round_up(nclass, 128)

    # HBM-side padding + bf16 cast (halves adj traffic; accumulation stays f32).
    x_p = _pad2(x, n_p, f_in, jnp.bfloat16)
    adj_p = _pad2(adj, n_p, n_p, jnp.bfloat16)
    w1_p = _pad2(w1, f_in, h_p, jnp.bfloat16)
    b1_p = _pad2(b1, 1, h_p, jnp.float32)
    w2_p = _pad2(w2, h_p, c_p, jnp.bfloat16)
    b2_p = _pad2(b2, 1, c_p, jnp.float32)

    # Layer 1: h1 = relu(adj @ (x @ W1) + b1)
    if f_in <= h_p:
        # Fused: x is no wider than s1 would be, so project on the fly.
        h1 = graph_aggregate(adj_p, x_p, b1_p, tm=tile, tk=tile,
                             activation="relu", valid_cols=h_p,
                             out_dtype=jnp.bfloat16, vmem_limit=vmem_limit,
                             w=w1_p)
    else:
        # Not fused: streaming x would cost more HBM bytes than streaming s1.
        s1 = feature_matmul(x_p, w1_p, tm=tile, vmem_limit=vmem_limit,
                            out_dtype=jnp.bfloat16)
        h1 = graph_aggregate(adj_p, s1, b1_p, tm=tile, tk=tile,
                             activation="relu", valid_cols=h_p,
                             out_dtype=jnp.bfloat16, vmem_limit=vmem_limit)

    # dropout(training=False) -> identity

    # Layer 2 (fused): out = log_softmax(adj @ (h1 @ W2) + b2, axis=1)
    # W2 stays resident in VMEM; s2 never round-trips through HBM.
    out_full = graph_aggregate(adj_p, h1, b2_p, tm=tile, tk=tile,
                               activation="log_softmax", valid_cols=nclass,
                               out_dtype=jnp.float32, vmem_limit=vmem_limit,
                               w=w2_p)

    return out_full[:N, :nclass]


def reference_forward(x, adj, w1, b1, w2, b2):
    h1 = jnp.maximum(adj @ (x @ w1) + b1, 0.0)
    h2 = adj @ (h1 @ w2) + b2
    return jax.nn.log_softmax(h2, axis=1)


if __name__ == "__main__":
    # Small, module-consistent shapes: N nodes, nfeat -> nhid -> nclass.
    # nfeat > nhid so layer 1 exercises the standalone feature matmul while
    # layer 2 exercises the fused projection+aggregation path.
    N, nfeat, nhid, nclass = 64, 200, 32, 8

    key = jax.random.PRNGKey(0)
    k_x, k_a, k_w1, k_b1, k_w2, k_b2 = jax.random.split(key, 6)

    # Node features
    x = jax.random.normal(k_x, (N, nfeat), dtype=jnp.float32)

    # Symmetric adjacency with self-loops, symmetric-normalized (glue, plain JAX)
    a_raw = (jax.random.uniform(k_a, (N, N)) > 0.7).astype(jnp.float32)
    a_sym = jnp.clip(a_raw + a_raw.T, 0.0, 1.0) + jnp.eye(N, dtype=jnp.float32)
    deg = jnp.sum(a_sym, axis=1)
    d_inv_sqrt = 1.0 / jnp.sqrt(deg)
    adj = a_sym * d_inv_sqrt[:, None] * d_inv_sqrt[None, :]

    # GraphConvolution-style init: weight [in, out], bias [out]
    lim1 = 1.0 / jnp.sqrt(jnp.float32(nhid))
    lim2 = 1.0 / jnp.sqrt(jnp.float32(nclass))
    w1 = jax.random.uniform(k_w1, (nfeat, nhid), minval=-lim1, maxval=lim1,
                            dtype=jnp.float32)
    b1 = jax.random.uniform(k_b1, (nhid,), minval=-lim1, maxval=lim1,
                            dtype=jnp.float32)
    w2 = jax.random.uniform(k_w2, (nhid, nclass), minval=-lim2, maxval=lim2,
                            dtype=jnp.float32)
    b2 = jax.random.uniform(k_b2, (nclass,), minval=-lim2, maxval=lim2,
                            dtype=jnp.float32)

    out = gcn_mod_forward(x, adj, w1, b1, w2, b2)
    out = jax.block_until_ready(out)

    ref = reference_forward(x, adj, w1, b1, w2, b2)
    assert out.shape == (N, nclass)
    # bf16 MXU inputs (f32 accumulation) -> looser tolerance than pure f32.
    assert jnp.allclose(out, ref, atol=5e-2, rtol=5e-2), "mismatch vs reference"

    print("KERNEL_OK")
</pallas_src>

<mosaic_0001>
module attributes {stable_mosaic.version = 11 : i64} {
  func.func @feature_matmul_kernel(%arg0: i32, %arg1: memref<128x256xbf16, #tpu.memory_space<vmem>>, %arg2: memref<256x128xbf16, #tpu.memory_space<vmem>>, %arg3: memref<128x128xbf16, #tpu.memory_space<vmem>>) attributes {dimension_semantics = [#tpu.dimension_semantics<parallel>], iteration_bounds = array<i64: 1>, scalar_prefetch = 0 : i64, scratch_operands = 0 : i64, tpu.core_type = #tpu.core_type<tc>, window_params = [{transform_indices = @transform_0, window_bounds = array<i64: 128, 256>}, {pipeline_mode = #tpu.pipeline_mode<synchronous>, transform_indices = @transform_1, window_bounds = array<i64: 256, 128>}, {transform_indices = @transform_2, window_bounds = array<i64: 128, 128>}]} {
    %c0 = arith.constant 0 : index
    %c0_0 = arith.constant 0 : index
    %0 = vector.load %arg1[%c0, %c0_0] : memref<128x256xbf16, #tpu.memory_space<vmem>>, vector<128x256xbf16>
    %c0_1 = arith.constant 0 : index
    %c0_2 = arith.constant 0 : index
    %1 = vector.load %arg2[%c0_1, %c0_2] : memref<256x128xbf16, #tpu.memory_space<vmem>>, vector<256x128xbf16>
    %cst = arith.constant dense<0.000000e+00> : vector<128x128xf32>
    %2 = tpu.matmul %0, %1, %cst {dimension_numbers = #tpu.dot_dimension_numbers<[1], [0], [0], [1], [0, 0, 1, 1], [], []>} : vector<128x256xbf16>, vector<256x128xbf16>, vector<128x128xf32> -> vector<128x128xf32>
    %3 = arith.truncf %2 : vector<128x128xf32> to vector<128x128xbf16>
    %c0_3 = arith.constant 0 : index
    %c0_4 = arith.constant 0 : index
    %4 = vector.load %arg3[%c0_3, %c0_4] : memref<128x128xbf16, #tpu.memory_space<vmem>>, vector<128x128xbf16>
    tpu.vector_store %arg3[%c0_3, %c0_4], %3 {strides = array<i32>} : memref<128x128xbf16, #tpu.memory_space<vmem>>, vector<128x128xbf16>,
    return
  }
  func.func @transform_0(%arg0: i32) -> (i32, i32) {
    %c0_i32 = arith.constant 0 : i32
    %c0_i32_0 = arith.constant 0 : i32
    return %arg0, %c0_i32 : i32, i32
  }
  func.func @transform_1(%arg0: i32) -> (i32, i32) {
    %c0_i32 = arith.constant 0 : i32
    %c0_i32_0 = arith.constant 0 : i32
    %c0_i32_1 = arith.constant 0 : i32
    return %c0_i32, %c0_i32_0 : i32, i32
  }
  func.func @transform_2(%arg0: i32) -> (i32, i32) {
    %c0_i32 = arith.constant 0 : i32
    %c0_i32_0 = arith.constant 0 : i32
    return %arg0, %c0_i32 : i32, i32
  }
}

</mosaic_0001>

<bundles_post_ra>
// kernel: tpu_custom_call.1
= control target key start
LH: loop header
LB: loop body
LE: loop exit
PB: predicated region body
PF: predicated region fallthrough
CT: control target
= control target key end

     0   :  { %7 = vsyncpa [#allocation3], 0  ;;  %s834_s0 = inlined_call_operand.hbm [shape: bf16[128,256], index: 0, kind: input, shape index: {}]   ;;  %s835_s1 = inlined_call_operand.hbm [shape: bf16[256,128], index: 1, kind: input, shape index: {}]   ;;  %s836_s2 = inlined_call_operand.hbm [shape: bf16[128,128], index: 2, kind: output, shape index: {}]  }
   0x1   :  { %8 = vsyncpa [#allocation6], 0 }
   0x2   :  { %9 = vsyncpa [#allocation4], 0  ;;  %s770_s9 = smov [#allocation2]   ;;  %s698_s13 = scalar_lea.hbm %s834_s0, 2048 }
   0x3   :  { %s15_s10 = sshll.u32 %s770_s9, 4  ;;  %p699_p0 = scmp.ne.s32.totalorder %s834_s0, %s698_s13  ;;  %s16_s10 = int_to_ptr.vmem [resolvable:$true] %s15_s10 }
   0x4   :  { %p702_p1 = scmp.lt.u32.totalorder %s698_s13, %s834_s0 }
   0x6   :  { %p704_p2 = pnand %p702_p1, %p699_p0 }
   0x8   :  { %707 = shalt.err (!%p704_p2)
}
   0x9   :  { %s708_s18 = scalar_lea.vmem %s16_s10, 2048  ;;  %p713_p4 = scmp.lt.s32.totalorder %s16_s10, %s16_s10 }
   0xa   :  { %p709_p3 = scmp.ne.s32.totalorder %s16_s10, %s708_s18  ;;  %p714_p5 = scmp.lt.s32.totalorder %s708_s18, %s708_s18 }
   0xc   :  { %p715_p6 = por %p714_p5, %p713_p4 }
   0xe   :  { %p716_p7 = pnand %p715_p6, %p709_p3 }
  0x10   :  { %719 = shalt.err (!%p716_p7)
}
  0x11   :  { %s771_s19 = smov 128   ;;  %s772_s20 = smov 8  }
  0x12   :  { %21 = dma.hbm_to_vmem [thread:$0]  %s834_s0, 2048, %s16_s10, [#allocation3], %s771_s19, %s771_s19, %s772_s20  }
  0x13   :  { %s773_s23 = smov [#allocation5]   ;;  %s720_s27 = scalar_lea.hbm %s835_s1, 2048 }
  0x14   :  { %s27_s24 = sshll.u32 %s773_s23, 4  ;;  %p721_p8 = scmp.ne.s32.totalorder %s835_s1, %s720_s27  ;;  %s28_s24 = int_to_ptr.vmem [resolvable:$true] %s27_s24 }
  0x15   :  { %p724_p9 = scmp.lt.u32.totalorder %s720_s27, %s835_s1 }
  0x17   :  { %p726_p10 = pnand %p724_p9, %p721_p8 }
  0x19   :  { %729 = shalt.err (!%p726_p10)
}
  0x1a   :  { %s730_s4 = scalar_lea.vmem %s28_s24, 2048  ;;  %p735_p12 = scmp.lt.s32.totalorder %s28_s24, %s28_s24 }
  0x1b   :  { %p731_p11 = scmp.ne.s32.totalorder %s28_s24, %s730_s4  ;;  %p736_p13 = scmp.lt.s32.totalorder %s730_s4, %s730_s4 }
  0x1d   :  { %p737_p0 = por %p736_p13, %p735_p12 }
  0x1f   :  { %p738_p1 = pnand %p737_p0, %p731_p11 }
  0x21   :  { %741 = shalt.err (!%p738_p1)
}
  0x22   :  { %s774_s0 = smov 64   ;;  %s775_s5 = smov 4  }
  0x23   :  { %33 = dma.hbm_to_vmem [thread:$0]  %s835_s1, 2048, %s28_s24, [#allocation6], %s774_s0, %s774_s0, %s775_s5  }
  0x24   :  { %764 = dma.done.wait [#allocation3], 2048  }
  0x25   :  { %765 = vsyncadd [#allocation3], 4294965248 }
  0x26   :  { %766 = dma.done.wait [#allocation6], 2048  }
  0x27   :  { %767 = vsyncadd [#allocation6], 4294965248  ;;  %v658_v0 = vld [vmem:[#allocation5 + $0x40] sm:$0xff]   ;;  %v660_v2 = vld [vmem:[#allocation5 + $0x48] sm:$0xff]   ;;  %s776_s1 = smov [#allocation7]  }
  0x28   :  { %v659_v1 = vld [vmem:[#allocation5] sm:$0xff]   ;;  %571 = vmatprep.subr.bf16.mxu0 %v658_v0  ;;  %635 = vmatprep.subr.bf16.mxu1 %v658_v0  ;;  %v661_v3 = vld [vmem:[#allocation5 + $0x8] sm:$0xff]   ;;  %v662_v4 = vld [vmem:[#allocation5 + $0x50] sm:$0xff]   ;;  %s447_s8 = sshll.u32 %s776_s1, 4  ;;  %s448_s8 = int_to_ptr.vmem [resolvable:$true] %s447_s8 }
  0x29   :  { %572 = vmatpush3.bf16.msra.mxu0 %v659_v1  ;;  %643 = vmatpush3.bf16.msra.mxu1 %v659_v1  ;;  %v663_v5 = vld [vmem:[#allocation5 + $0x10] sm:$0xff]   ;;  %v664_v6 = vld [vmem:[#allocation5 + $0x58] sm:$0xff]   ;;  %v666_v8 = vld [vmem:[#allocation5 + $0x60] sm:$0xff]   ;;  %s742_s9 = scalar_lea.vmem %s448_s8, 1024  ;;  %p747_p3 = scmp.lt.s32.totalorder %s448_s8, %s448_s8 }
  0x2a   :  { %573 = vmatprep.subr.bf16.mxu0 %v660_v2  ;;  %636 = vmatprep.subr.bf16.mxu1 %v660_v2  ;;  %v665_v7 = vld [vmem:[#allocation5 + $0x18] sm:$0xff]   ;;  %v667_v9 = vld [vmem:[#allocation5 + $0x20] sm:$0xff]   ;;  %v668_v10 = vld [vmem:[#allocation5 + $0x68] sm:$0xff]   ;;  %p743_p2 = scmp.ne.s32.totalorder %s448_s8, %s742_s9  ;;  %p748_p4 = scmp.lt.s32.totalorder %s742_s9, %s742_s9 }
  0x2b   :  { %v676_v11 = vld [vmem:[#allocation2 + $0x4] ss:$8 sps:$4 sm:$0xff]   ;;  %v670_v14 = vld [vmem:[#allocation5 + $0x70] sm:$0xff]   ;;  %v672_v16 = vld [vmem:[#allocation5 + $0x78] sm:$0xff]  }
  0x2c   :  { %v679_v12 = vld [vmem:[#allocation2 + $0x44] ss:$8 sps:$4 sm:$0xff]   ;;  %297 = vmatprep.mubr.bf16.mxu0 %v676_v11  ;;  %v671_v15 = vld [vmem:[#allocation5 + $0x30] sm:$0xff]   ;;  %v673_v17 = vld [vmem:[#allocation5 + $0x38] sm:$0xff]   ;;  %p749_p5 = por %p748_p4, %p747_p3 }
  0x2d   :  { %574 = vmatpush3.bf16.msra.mxu0 %v661_v3  ;;  %644 = vmatpush3.bf16.msra.mxu1 %v661_v3  ;;  %v669_v13 = vld [vmem:[#allocation5 + $0x28] sm:$0xff]   ;;  %v680_v20 = vld [vmem:[#allocation2 + $0x14] ss:$8 sps:$4 sm:$0xff]   ;;  %v684_v22 = vld [vmem:[#allocation2 + $0x10] ss:$8 sps:$4 sm:$0xff]  }
  0x2e   :  { %575 = vmatprep.subr.bf16.mxu0 %v662_v4  ;;  %637 = vmatprep.subr.bf16.mxu1 %v662_v4  ;;  %v674_v18 = vld [vmem:[#allocation2] ss:$8 sps:$4 sm:$0xff]   ;;  %v682_v21 = vld [vmem:[#allocation2 + $0x54] ss:$8 sps:$4 sm:$0xff]   ;;  %v685_v23 = vld [vmem:[#allocation2 + $0x50] ss:$8 sps:$4 sm:$0xff]   ;;  %p750_p6 = pnand %p749_p5, %p743_p2 }
  0x2f   :  { %329 = vmatprep.mubr.bf16.mxu1 %v679_v12  ;;  %v677_v19 = vld [vmem:[#allocation2 + $0x40] ss:$8 sps:$4 sm:$0xff]   ;;  %v686_v24 = vld [vmem:[#allocation2 + $0x24] ss:$8 sps:$4 sm:$0xff]   ;;  %v692_v28 = vld [vmem:[#allocation2 + $0x34] ss:$8 sps:$4 sm:$0xff]  }
  0x30   :  { %v688_v25 = vld [vmem:[#allocation2 + $0x64] ss:$8 sps:$4 sm:$0xff]   ;;  %v690_v26 = vld [vmem:[#allocation2 + $0x20] ss:$8 sps:$4 sm:$0xff]   ;;  %v694_v29 = vld [vmem:[#allocation2 + $0x74] ss:$8 sps:$4 sm:$0xff]  }
  0x31   :  { %576 = vmatpush3.bf16.msra.mxu0 %v663_v5  ;;  %645 = vmatpush3.bf16.msra.mxu1 %v663_v5  ;;  %v691_v27 = vld [vmem:[#allocation2 + $0x60] ss:$8 sps:$4 sm:$0xff]   ;;  %v696_v30 = vld [vmem:[#allocation2 + $0x30] ss:$8 sps:$4 sm:$0xff]  }
  0x32   :  { %577 = vmatprep.subr.bf16.mxu0 %v664_v6  ;;  %638 = vmatprep.subr.bf16.mxu1 %v664_v6  ;;  %v697_v31 = vld [vmem:[#allocation2 + $0x70] ss:$8 sps:$4 sm:$0xff]  }
  0x35   :  { %578 = vmatpush3.bf16.msra.mxu0 %v665_v7  ;;  %646 = vmatpush3.bf16.msra.mxu1 %v665_v7 }
  0x36   :  { %579 = vmatprep.subr.bf16.mxu0 %v666_v8  ;;  %639 = vmatprep.subr.bf16.mxu1 %v666_v8 }
  0x39   :  { %580 = vmatpush3.bf16.msra.mxu0 %v667_v9  ;;  %647 = vmatpush3.bf16.msra.mxu1 %v667_v9 }
  0x3a   :  { %581 = vmatprep.subr.bf16.mxu0 %v668_v10  ;;  %640 = vmatprep.subr.bf16.mxu1 %v668_v10 }
  0x3d   :  { %582 = vmatpush3.bf16.msra.mxu0 %v669_v13  ;;  %648 = vmatpush3.bf16.msra.mxu1 %v669_v13 }
  0x3e   :  { %583 = vmatprep.subr.bf16.mxu0 %v670_v14  ;;  %641 = vmatprep.subr.bf16.mxu1 %v670_v14 }
  0x41   :  { %584 = vmatpush3.bf16.msra.mxu0 %v671_v15  ;;  %649 = vmatpush3.bf16.msra.mxu1 %v671_v15 }
  0x42   :  { %585 = vmatprep.subr.bf16.mxu0 %v672_v16  ;;  %642 = vmatprep.subr.bf16.mxu1 %v672_v16 }
  0x45   :  { %586 = vmatpush3.bf16.msra.mxu0 %v673_v17  ;;  %650 = vmatpush3.bf16.msra.mxu1 %v673_v17 }
  0x48   :  { %298 = vmatmul.mubr.bf16.vlgmr.msra.gmra.mrb[0].mxu0 %v674_v18  ;;  %330 = vmatmul.mubr.bf16.vlgmr.msra.gmra.mrb[0].mxu1 %v677_v19 }
  0x49   :  { %305 = vmatprep.mubr.bf16.mxu0 %v680_v20  ;;  %337 = vmatprep.mubr.bf16.mxu1 %v682_v21 }
  0x50   :  { %306 = vmatmul.mubr.bf16.gmra.mrb[4].mxu0 %v684_v22  ;;  %338 = vmatmul.mubr.bf16.gmra.mrb[4].mxu1 %v685_v23 }
  0x51   :  { %313 = vmatprep.mubr.bf16.mxu0 %v686_v24  ;;  %345 = vmatprep.mubr.bf16.mxu1 %v688_v25 }
  0x58   :  { %314 = vmatmul.mubr.bf16.gmra.mrb[8].mxu0 %v690_v26  ;;  %346 = vmatmul.mubr.bf16.gmra.mrb[8].mxu1 %v691_v27 }
  0x59   :  { %321 = vmatprep.mubr.bf16.mxu0 %v692_v28  ;;  %353 = vmatprep.mubr.bf16.mxu1 %v694_v29 }
  0x60   :  { %322 = vmatmul.mubr.bf16.gmra.mrb[12].mxu0 %v696_v30  ;;  %354 = vmatmul.mubr.bf16.gmra.mrb[12].mxu1 %v697_v31 }
 0x11b   :  { %v587_v32 = vpop.f32.mrb[0].mxu0  ;;  %v611_v33 = vpop.f32.mrb[0].mxu1 }
 0x11c   :  { %v588_v34 = vpop.f32.mrb[1].mxu0  ;;  %v612_v35 = vpop.f32.mrb[1].mxu1 }
 0x11d   :  { %v589_v36 = vadd.f32 %v588_v34, %v587_v32  ;;  %v613_v37 = vadd.f32 %v612_v35, %v611_v33  ;;  %v590_v38 = vpop.f32.mrb[2].mxu0  ;;  %v614_v39 = vpop.f32.mrb[2].mxu1 }
 0x11e   :  { %v591_v40 = vpop.f32.mrb[3].mxu0  ;;  %v615_v41 = vpop.f32.mrb[3].mxu1 }
 0x11f   :  { %v592_v42 = vadd.f32 %v591_v40, %v590_v38  ;;  %v616_v43 = vadd.f32 %v615_v41, %v614_v39 }
 0x121   :  { %v527_v44 = vpack.c.bf16 %v592_v42, %v589_v36  ;;  %v547_v45 = vpack.c.bf16 %v616_v43, %v613_v37 }
 0x123   :  { %528 = vst [vmem:[#allocation7] sm:$0xff] %v527_v44   ;;  %567 = vst [vmem:[#allocation7 + $0x20] sm:$0xff] %v547_v45   ;;  %v593_v46 = vpop.f32.mrb[4].mxu0  ;;  %v617_v47 = vpop.f32.mrb[4].mxu1 }
 0x124   :  { %v594_v48 = vpop.f32.mrb[5].mxu0  ;;  %v618_v49 = vpop.f32.mrb[5].mxu1 }
 0x125   :  { %v595_v50 = vadd.f32 %v594_v48, %v593_v46  ;;  %v619_v51 = vadd.f32 %v618_v49, %v617_v47  ;;  %v596_v52 = vpop.f32.mrb[6].mxu0  ;;  %v620_v53 = vpop.f32.mrb[6].mxu1 }
 0x126   :  { %v597_v54 = vpop.f32.mrb[7].mxu0  ;;  %v621_v55 = vpop.f32.mrb[7].mxu1 }
 0x127   :  { %v598_v56 = vadd.f32 %v597_v54, %v596_v52  ;;  %v622_v57 = vadd.f32 %v621_v55, %v620_v53 }
 0x129   :  { %v532_v58 = vpack.c.bf16 %v598_v56, %v595_v50  ;;  %v552_v59 = vpack.c.bf16 %v622_v57, %v619_v51 }
 0x12b   :  { %564 = vst [vmem:[#allocation7 + $0x8] sm:$0xff] %v532_v58   ;;  %568 = vst [vmem:[#allocation7 + $0x28] sm:$0xff] %v552_v59   ;;  %v599_v60 = vpop.f32.mrb[8].mxu0  ;;  %v623_v61 = vpop.f32.mrb[8].mxu1 }
 0x12c   :  { %v600_v62 = vpop.f32.mrb[9].mxu0  ;;  %v624_v63 = vpop.f32.mrb[9].mxu1 }
 0x12d   :  { %v601_v0 = vadd.f32 %v600_v62, %v599_v60  ;;  %v625_v1 = vadd.f32 %v624_v63, %v623_v61  ;;  %v602_v2 = vpop.f32.mrb[10].mxu0  ;;  %v626_v3 = vpop.f32.mrb[10].mxu1 }
 0x12e   :  { %v603_v4 = vpop.f32.mrb[11].mxu0  ;;  %v627_v5 = vpop.f32.mrb[11].mxu1 }
 0x12f   :  { %v604_v6 = vadd.f32 %v603_v4, %v602_v2  ;;  %v628_v7 = vadd.f32 %v627_v5, %v626_v3 }
 0x131   :  { %v537_v8 = vpack.c.bf16 %v604_v6, %v601_v0  ;;  %v557_v9 = vpack.c.bf16 %v628_v7, %v625_v1 }
 0x133   :  { %565 = vst [vmem:[#allocation7 + $0x10] sm:$0xff] %v537_v8   ;;  %569 = vst [vmem:[#allocation7 + $0x30] sm:$0xff] %v557_v9   ;;  %v605_v10 = vpop.f32.mrb[12].mxu0  ;;  %v629_v11 = vpop.f32.mrb[12].mxu1 }
 0x134   :  { %v606_v12 = vpop.f32.mrb[13].mxu0  ;;  %v630_v13 = vpop.f32.mrb[13].mxu1 }
 0x135   :  { %v607_v14 = vadd.f32 %v606_v12, %v605_v10  ;;  %v631_v15 = vadd.f32 %v630_v13, %v629_v11  ;;  %v608_v16 = vpop.f32.mrb[14].mxu0  ;;  %v632_v17 = vpop.f32.mrb[14].mxu1 }
 0x136   :  { %v609_v18 = vpop.f32.mrb[15].mxu0  ;;  %v633_v19 = vpop.f32.mrb[15].mxu1 }
 0x137   :  { %v610_v20 = vadd.f32 %v609_v18, %v608_v16  ;;  %v634_v21 = vadd.f32 %v633_v19, %v632_v17 }
 0x139   :  { %v542_v22 = vpack.c.bf16 %v610_v20, %v607_v14  ;;  %v562_v23 = vpack.c.bf16 %v634_v21, %v631_v15 }
 0x13b   :  { %566 = vst [vmem:[#allocation7 + $0x18] sm:$0xff] %v542_v22   ;;  %570 = vst [vmem:[#allocation7 + $0x38] sm:$0xff] %v562_v23  }
 0x13c   :  { %753 = shalt.err (!%p750_p6)
}
 0x13d   :  { %s754_s12 = scalar_lea.hbm %s836_s2, 1024 }
 0x13e   :  { %p755_p7 = scmp.ne.s32.totalorder %s836_s2, %s754_s12  ;;  %p758_p8 = scmp.lt.u32.totalorder %s754_s12, %s836_s2 }
 0x140   :  { %p760_p9 = pnand %p758_p8, %p755_p7 }
 0x142   :  { %763 = shalt.err (!%p760_p9)
}
 0x143   :  { %453 = dma.vmem_to_hbm [thread:$0]  %s448_s8, 1024, %s836_s2, [#allocation4], %s774_s0, %s774_s0, %s775_s5  }
 0x144   :  { %768 = dma.done.wait [#allocation4], 1024  }
 0x145   :  { %769 = vsyncadd [#allocation4], 4294966272 }
 0x146   :  { %457 = vsyncpa [#allocation3], 1 }
 0x147   :  { %458 = vsyncpa [#allocation6], 1 }
 0x148   :  { %459 = vsyncpa [#allocation4], 1 }

</bundles_post_ra>
